<compile_context>
chip_gen: v7x
topology: tpu7x:2x2x1
jax: 0.10.0
libtpu: 0.0.40
codegen_flags: <defaults>
</compile_context>

<pallas_src>
import jax
import jax.numpy as jnp
from jax import lax
from jax.experimental import pallas as pl
from jax.experimental.pallas import tpu as pltpu


def _biaffine_kernel(t_ref, ht_ref, bd_ref, o_ref):
    # t_ref : (1, TQ, d)   left operand  (= D @ U_main + u_row, head-linear folded)
    # ht_ref: (1, d,  TK)  head representations, pre-transposed (lane-dense TK)
    # bd_ref: (1, TQ, 1)   per-dependent-row linear bias (f32)
    # o_ref : (1, TQ, TK)  scores
    scores = lax.dot_general(
        t_ref[0], ht_ref[0],
        dimension_numbers=(((1,), (0,)), ((), ())),   # plain (TQ,d)x(d,TK) matmul
        preferred_element_type=jnp.float32,
    )                                                 # [TQ, TK] f32 accumulation
    o_ref[0] = (scores + bd_ref[0]).astype(o_ref.dtype)


def _round_up(x, m):
    return (x + m - 1) // m * m


def _choose_tile(s, max_tile, granule, overhead_elems=96):
    """Pick (tile, padded_s).

    tile is a multiple of `granule`, <= max_tile, and divides padded_s exactly.
    Cost model: padded bytes inflated by a per-grid-step overhead term, so we
    keep padding near the 8/128 granule minimum while avoiding degenerate tiny
    tiles (e.g. S = 8 * prime) that would explode the step count.
    """
    max_tile = max(granule, (max_tile // granule) * granule)
    best = None   # (cost, tile, pad)
    t = granule
    while t <= max_tile:
        pad = _round_up(s, t)
        cost = pad * (t + overhead_elems) / t
        if (best is None or cost < best[0] - 1e-9
                or (abs(cost - best[0]) < 1e-9 and t > best[1])):
            best = (cost, t, pad)
        t += granule
    return best[1], best[2]


def biaffine(D, H, U, W, *, tq=1024, tk=1024,
             compute_dtype=None, out_dtype=jnp.float32):
    """Biaffine scores.

    D, H: [B, S, d], U: [d+1, d], W: [2d+1]  ->  [B, S, S]

    compute_dtype: dtype of the MXU operands (e.g. jnp.bfloat16 on v6e/v7x).
      Accumulation is always f32.
    out_dtype: dtype of the returned scores.  The kernel is output-write bound,
      so jnp.bfloat16 roughly halves wall-clock when downstream tolerates it.
    """
    B, S, d = D.shape
    dp1 = d + 1
    assert U.shape == (dp1, d) and W.shape == (2 * d + 1,)

    # ---- Fold W into the bilinear form; hoist the tiny first GEMM to XLA ----
    U_main = U[:d, :]                         # [d, d]
    u_row = U[d, :] + W[dp1:]                 # [d] : ones-row of U + head-side W
    D2 = D.reshape(B * S, d)
    T = (jnp.dot(D2, U_main) + u_row).reshape(B, S, d)             # [B, S, d]
    bd = (jnp.dot(D2.astype(jnp.float32), W[:d].astype(jnp.float32))
          + W[d].astype(jnp.float32)).reshape(B, S, 1)             # [B, S, 1] f32
    bd = bd.astype(jnp.float32)

    if compute_dtype is not None:
        T = T.astype(compute_dtype)
        Hk = H.astype(compute_dtype)
    else:
        Hk = H

    # ---- Tile the S x S output (pad only to 8 / 128 granules, not full tile) ----
    TQ, sq_pad = _choose_tile(S, tq, 8)       # sublane granule
    TK, sk_pad = _choose_tile(S, tk, 128)     # lane granule -> lane-dense stores

    # v7x has 2 TensorCores: make sure at least one "parallel" axis has >= 2 steps.
    if B == 1 and (sq_pad // TQ) == 1 and (sk_pad // TK) == 1:
        if TQ % 16 == 0:
            TQ //= 2
        elif TK % 256 == 0:
            TK //= 2

    if sq_pad != S:
        T = jnp.pad(T, ((0, 0), (0, sq_pad - S), (0, 0)))
        bd = jnp.pad(bd, ((0, 0), (0, sq_pad - S), (0, 0)))
    Ht = jnp.swapaxes(Hk, 1, 2)               # [B, d, S] -> lane-dense RHS tiles
    if sk_pad != S:
        Ht = jnp.pad(Ht, ((0, 0), (0, 0), (0, sk_pad - S)))

    grid = (B, sq_pad // TQ, sk_pad // TK)

    in_itemsize = jnp.dtype(T.dtype).itemsize
    out_itemsize = jnp.dtype(out_dtype).itemsize

    # Double-buffered VMEM per step; only raise the scoped limit when needed
    # (v5e default scoped limit is 16 MiB; keep well under v7x's 64 MiB physical).
    vmem_need = 2 * (TQ * d * in_itemsize + d * TK * in_itemsize
                     + TQ * 4 + TQ * TK * out_itemsize)
    vmem_limit = None
    if vmem_need > (12 << 20):
        vmem_limit = min(vmem_need + (8 << 20), 48 << 20)

    cost = pl.CostEstimate(
        flops=2 * B * sq_pad * sk_pad * d,
        transcendentals=0,
        bytes_accessed=(B * sq_pad * sk_pad * out_itemsize
                        + B * sq_pad * d * in_itemsize
                        + B * d * sk_pad * in_itemsize
                        + B * sq_pad * 4),
    )

    grid_spec = pltpu.PrefetchScalarGridSpec(
        num_scalar_prefetch=0,
        grid=grid,
        in_specs=[
            pl.BlockSpec((1, TQ, d), lambda b, i, j: (b, i, 0)),   # T tile
            pl.BlockSpec((1, d, TK), lambda b, i, j: (b, 0, j)),   # H^T tile
            pl.BlockSpec((1, TQ, 1), lambda b, i, j: (b, i, 0)),   # bd tile
        ],
        out_specs=pl.BlockSpec((1, TQ, TK), lambda b, i, j: (b, i, j)),
    )

    out = pl.pallas_call(
        _biaffine_kernel,
        out_shape=jax.ShapeDtypeStruct((B, sq_pad, sk_pad), out_dtype),
        grid_spec=grid_spec,
        compiler_params=pltpu.CompilerParams(
            dimension_semantics=("parallel", "parallel", "parallel"),
            vmem_limit_bytes=vmem_limit),
        cost_estimate=cost,
    )(T, Ht, bd)

    if sq_pad != S or sk_pad != S:
        out = out[:, :S, :S]
    return out


def biaffine_ref(D, H, U, W):
    """Pure-JAX reference matching the PyTorch forward exactly."""
    B, S, d = D.shape
    ones = jnp.ones((B, S, 1), dtype=D.dtype)
    D_aug = jnp.concatenate([D, ones], axis=2)
    U_product = jnp.einsum('bxi,ij,byj->bxy', D_aug, U, H)
    D_exp = jnp.broadcast_to(D_aug[:, :, None, :], (B, S, S, d + 1))
    H_exp = jnp.broadcast_to(H[:, None, :, :], (B, S, S, d))
    concat = jnp.concatenate([D_exp, H_exp], axis=3)
    W_product = jnp.einsum('ijkl,l->ijk', concat, W)
    return U_product + W_product


if __name__ == "__main__":
    B, S, d = 2, 8, 32

    key = jax.random.PRNGKey(0)
    k_d, k_h, k_u, k_w = jax.random.split(key, 4)

    D = jax.random.normal(k_d, (B, S, d), dtype=jnp.float32)
    H = jax.random.normal(k_h, (B, S, d), dtype=jnp.float32)

    # Parameters (PyTorch __init__ shapes).  W is nonzero here so the linear
    # term (W_d / W_h split and bias orientation) is actually validated.
    fan_in, fan_out = d + 1, d
    xavier_std = (2.0 / (fan_in + fan_out)) ** 0.5
    U = xavier_std * jax.random.normal(k_u, (d + 1, d), dtype=jnp.float32)
    W = 0.1 * jax.random.normal(k_w, (2 * d + 1,), dtype=jnp.float32)

    ref = biaffine_ref(D, H, U, W)

    # f32 path (PyTorch parity).
    out = jax.block_until_ready(biaffine(D, H, U, W))
    assert out.shape == (B, S, S)
    assert jnp.allclose(out, ref, atol=1e-4, rtol=1e-4), "f32 mismatch vs reference"

    # Tiled + minimally padded path on a ragged sequence length.
    S2 = 200
    k_d2, k_h2 = jax.random.split(jax.random.PRNGKey(1), 2)
    D2 = jax.random.normal(k_d2, (B, S2, d), dtype=jnp.float32)
    H2 = jax.random.normal(k_h2, (B, S2, d), dtype=jnp.float32)
    ref2 = biaffine_ref(D2, H2, U, W)
    out2 = jax.block_until_ready(biaffine(D2, H2, U, W, tq=128, tk=128))
    assert out2.shape == (B, S2, S2)
    assert jnp.allclose(out2, ref2, atol=1e-4, rtol=1e-4), "tiled mismatch vs reference"

    # bf16 MXU-operand path (v6e/v7x); f32 accumulation, looser tolerance.
    out_bf16c = jax.block_until_ready(biaffine(D, H, U, W, compute_dtype=jnp.bfloat16))
    assert jnp.allclose(out_bf16c, ref, atol=0.25, rtol=0.05), "bf16-compute mismatch"

    # bf16 OUTPUT path (halves HBM writeback on the write-bound kernel).
    out_bf16o = jax.block_until_ready(biaffine(D, H, U, W, out_dtype=jnp.bfloat16))
    assert out_bf16o.dtype == jnp.bfloat16
    assert jnp.allclose(out_bf16o.astype(jnp.float32), ref, atol=0.25, rtol=0.05), \
        "bf16-output mismatch"

    print("KERNEL_OK")
</pallas_src>

<mosaic_0001>
module attributes {stable_mosaic.version = 11 : i64} {
  func.func @_biaffine_kernel(%arg0: i32, %arg1: i32, %arg2: i32, %arg3: memref<1x8x32xf32, #tpu.memory_space<vmem>>, %arg4: memref<1x32x128xf32, #tpu.memory_space<vmem>>, %arg5: memref<1x8x1xf32, #tpu.memory_space<vmem>>, %arg6: memref<1x8x128xf32, #tpu.memory_space<vmem>>) attributes {dimension_semantics = [#tpu.dimension_semantics<parallel>, #tpu.dimension_semantics<parallel>, #tpu.dimension_semantics<parallel>], iteration_bounds = array<i64: 2, 1, 1>, scalar_prefetch = 0 : i64, scratch_operands = 0 : i64, tpu.core_type = #tpu.core_type<tc>, window_params = [{transform_indices = @transform_0, window_bounds = array<i64: 1, 8, 32>}, {transform_indices = @transform_1, window_bounds = array<i64: 1, 32, 128>}, {transform_indices = @transform_2, window_bounds = array<i64: 1, 8, 1>}, {transform_indices = @transform_3, window_bounds = array<i64: 1, 8, 128>}]} {
    %c0 = arith.constant 0 : index
    %c0_0 = arith.constant 0 : index
    %c0_1 = arith.constant 0 : index
    %0 = vector.load %arg3[%c0, %c0_0, %c0_1] : memref<1x8x32xf32, #tpu.memory_space<vmem>>, vector<1x8x32xf32>
    %1 = vector.shape_cast %0 : vector<1x8x32xf32> to vector<8x32xf32>
    %c0_2 = arith.constant 0 : index
    %c0_3 = arith.constant 0 : index
    %c0_4 = arith.constant 0 : index
    %2 = vector.load %arg4[%c0_2, %c0_3, %c0_4] : memref<1x32x128xf32, #tpu.memory_space<vmem>>, vector<1x32x128xf32>
    %3 = vector.shape_cast %2 : vector<1x32x128xf32> to vector<32x128xf32>
    %cst = arith.constant dense<0.000000e+00> : vector<8x128xf32>
    %4 = tpu.matmul %1, %3, %cst {dimension_numbers = #tpu.dot_dimension_numbers<[1], [0], [0], [1], [0, 0, 1, 1], [], []>} : vector<8x32xf32>, vector<32x128xf32>, vector<8x128xf32> -> vector<8x128xf32>
    %c0_5 = arith.constant 0 : index
    %c0_6 = arith.constant 0 : index
    %c0_7 = arith.constant 0 : index
    %5 = vector.load %arg5[%c0_5, %c0_6, %c0_7] : memref<1x8x1xf32, #tpu.memory_space<vmem>>, vector<1x8x1xf32>
    %6 = vector.shape_cast %5 : vector<1x8x1xf32> to vector<8x1xf32>
    %7 = vector.broadcast %6 : vector<8x1xf32> to vector<8x128xf32>
    %8 = arith.addf %4, %7 : vector<8x128xf32>
    %c0_8 = arith.constant 0 : index
    %c0_9 = arith.constant 0 : index
    %c0_10 = arith.constant 0 : index
    %9 = vector.load %arg6[%c0_8, %c0_9, %c0_10] : memref<1x8x128xf32, #tpu.memory_space<vmem>>, vector<1x8x128xf32>
    %10 = vector.shape_cast %9 : vector<1x8x128xf32> to vector<8x128xf32>
    %11 = vector.shape_cast %8 : vector<8x128xf32> to vector<1x8x128xf32>
    tpu.vector_store %arg6[%c0_8, %c0_9, %c0_10], %11 {strides = array<i32>} : memref<1x8x128xf32, #tpu.memory_space<vmem>>, vector<1x8x128xf32>,
    return
  }
  func.func @transform_0(%arg0: i32, %arg1: i32, %arg2: i32) -> (i32, i32, i32) {
    %c0_i32 = arith.constant 0 : i32
    %c0_i32_0 = arith.constant 0 : i32
    return %arg0, %arg1, %c0_i32 : i32, i32, i32
  }
  func.func @transform_1(%arg0: i32, %arg1: i32, %arg2: i32) -> (i32, i32, i32) {
    %c0_i32 = arith.constant 0 : i32
    %c0_i32_0 = arith.constant 0 : i32
    return %arg0, %c0_i32, %arg2 : i32, i32, i32
  }
  func.func @transform_2(%arg0: i32, %arg1: i32, %arg2: i32) -> (i32, i32, i32) {
    %c0_i32 = arith.constant 0 : i32
    %c0_i32_0 = arith.constant 0 : i32
    return %arg0, %arg1, %c0_i32 : i32, i32, i32
  }
  func.func @transform_3(%arg0: i32, %arg1: i32, %arg2: i32) -> (i32, i32, i32) {
    %c0_i32 = arith.constant 0 : i32
    return %arg0, %arg1, %arg2 : i32, i32, i32
  }
}

</mosaic_0001>

<bundles_post_ra>
// kernel: tpu_custom_call.1
= control target key start
LH: loop header
LB: loop body
LE: loop exit
PB: predicated region body
PF: predicated region fallthrough
CT: control target
= control target key end

     0   :  { %8 = vsyncpa [#allocation3], 0  ;;  %s921_s0 = inlined_call_operand.vmem [shape: f32[2,8,32], index: 0, kind: input, shape index: {}]   ;;  %s922_s1 = inlined_call_operand.hbm [shape: f32[2,32,128], index: 1, kind: input, shape index: {}]   ;;  %s923_s2 = inlined_call_operand.vmem [shape: f32[2,8,1], index: 2, kind: input, shape index: {}]   ;;  %s924_s3 = inlined_call_operand.hbm [shape: f32[2,8,128], index: 3, kind: output, shape index: {}]  }
   0x1   :  { %10 = vsyncpa [#allocation3 + $0x1], 0 }
   0x2   :  { %11 = vsyncpa [#allocation4], 0 }
   0x3   :  { %13 = vsyncpa [#allocation4 + $0x1], 0  ;;  %s739_s12 = smov 0   ;;  %s741_s13 = smov 0  }
   0x4   :  { %s743_s14 = smov 0   ;;  %s745_s15 = smov 0  }
   0x5   :  { %s747_s16 = smov 0   ;;  %s749_s17 = smov 0  }
   0x6 LB: > { %s488_s18 = sadd.s32 4294967295, %s709_s17   ;;  %s489_s19 = sadd.s32 4294967294, %s709_s17   ;;  %s709_s17 = sphi %s749_s17, %s19_s17   ;;  %s705_s16 = sphi %s747_s16, %s939_s16   ;;  %s701_s15 = sphi %s745_s15, %s938_s15   ;;  %s697_s14 = sphi %s743_s14, %s937_s14   ;;  %s693_s13 = sphi %s741_s13, %s936_s13   ;;  %s689_s12 = sphi %s739_s12, %s935_s12  }
   0x7   : > { %s38_s20 = sadd.s32 1, %s705_s16  ;;  %s75_s21 = sadd.s32 1, %s697_s14 }
   0x8   : > { %p40_p0 = scmp.ge.s32.totalorder %s38_s20, 2  ;;  %p82_p1 = scmp.ne.s32.totalorder %s697_s14, %s693_s13 }
   0x9   : > { %p83_p2 = scmp.eq.s32.totalorder %s709_s17, 0  ;;  %p88_p3 = scmp.ne.s32.totalorder %s693_s13, %s689_s12 }
   0xa   : > { %s941_s20 = smov (%p40_p0, %s38_s20), 0  ;;  %p89_p5 = scmp.eq.s32.totalorder %s488_s18, 0 }
   0xb   : > { %p780_p4 = por %p83_p2, %p82_p1  ;;  %s70_s23 = ssub.s32 %s705_s16, %s941_s20 }
   0xc   : > { %p144_p6 = scmp.eq.s32.totalorder %s488_s18, 1  ;;  %p73_p7 = scmp.eq.s32.totalorder %s70_s23, 0 }
   0xd   : > { %p786_p8 = por %p89_p5, %p88_p3  ;;  %p150_p10 = scmp.eq.s32.totalorder %s489_s19, 1 }
   0xe   : > { %p790_p9 = por %p144_p6, %p82_p1  ;;  %p540_p13 = scmp.lt.s32.totalorder %s709_s17, 2 }
   0xf   : > { %s795_s26 = scalar_select %p73_p7, %s697_s14, %s75_s21  }
  0x10   : > { %s928_s25 = scalar_select %p790_p9, 1, 0 }
  0x11   : > { %p797_p11 = por %p150_p10, %p88_p3  ;;  %s180_s28 = sand.u32 1, %s697_s14  }
  0x12   : > { %s492_s29 = sshll.u32 %s180_s28, 5  ;;  %s505_s30 = sshll.u32 %s705_s16, 9 }
  0x13   : > { %s929_s27 = scalar_select %p797_p11, 1, 0 }
  0x14   : > { %s808_s6 = scalar_lea.hbm %s922_s1, %s505_s30  ;;  %s184_s7 = scalar_lea.vmem [#allocation2], %s492_s29 }
  0x15   : > { %s192_s8 = sshll.u32 %s184_s7, 4  ;;  %p814_p0 = pnand %p540_p13, %p780_p4  ;;  %s810_s8 = int_to_ptr.vmem [resolvable:$true] %s192_s8 }
  0x16   : > { %s819_s10 = scalar_lea.sflag [#allocation3], %s180_s28  ;;  %s597_s11 = scalar_lea.hbm %s808_s6, 512 }
  0x17   : > { %p598_p2 = scmp.ne.s32.totalorder %s808_s6, %s597_s11  ;;  %p599_p3 = pneg %p814_p0 }
  0x18   : > { %s602_s21 = scalar_lea.hbm %s922_s1, 1024  ;;  %p603_p4 = scmp.lt.u32.totalorder %s808_s6, %s922_s1 }
  0x19   : > { %p600_p5 = pnand %p599_p3, %p598_p2  ;;  %p604_p7 = scmp.lt.u32.totalorder %s602_s21, %s597_s11 }
  0x1a   : > { %p606_p13 = scmp.lt.u32.totalorder %s597_s11, %s808_s6 }
  0x1b   : > { %p601_p6 = pneg %p600_p5  ;;  %p605_p10 = por %p604_p7, %p603_p4 }
  0x1d   : > { %p607_p12 = por %p606_p13, %p605_p10 }
  0x1f   : > { %p608_p1 = pnand %p607_p12, %p601_p6 }
  0x21   : > { %611 = shalt.err (!%p608_p1)
}
  0x22   : > { %s612_s28 = scalar_lea.vmem %s810_s8, 512  ;;  %s711_s29 = smov [#allocation2]  }
  0x23   : > { %p613_p2 = scmp.ne.s32.totalorder %s810_s8, %s612_s28  ;;  %s617_s30 = sshll.u32 %s711_s29, 4  ;;  %s618_s30 = int_to_ptr.vmem [resolvable:$false] %s617_s30 }
  0x24   : > { %s619_s4 = scalar_lea.vmem %s618_s30, 1024  ;;  %p620_p9 = scmp.lt.s32.totalorder %s810_s8, %s618_s30 }
  0x25   : > { %p615_p5 = pnand %p613_p2, %p599_p3  ;;  %p621_p4 = scmp.lt.s32.totalorder %s619_s4, %s612_s28 }
  0x27   : > { %p616_p11 = pneg %p615_p5  ;;  %p622_p7 = por %p621_p4, %p620_p9 }
  0x29   : > { %p623_p10 = pnand %p622_p7, %p616_p11 }
  0x2b   : > { %626 = shalt.err (!%p623_p10)
}
  0x2c   : > { %s712_s5 = smov 128   ;;  %s713_s7 = smov 8  }
  0x2d   : > { %535 = dma.hbm_to_vmem [thread:$0]  (!%p814_p0), %s808_s6, 512, %s810_s8, %s819_s10, %s712_s5, %s712_s5, %s713_s7  }
  0x2e   : > { %p210_p12 = scmp.lt.s32.totalorder %s709_s17, 3  ;;  %p931_p1 = scmp.ge.s32.totalorder %s709_s17, 1 }
  0x30   : > { %p211_p3 = pnand %p931_p1, %p210_p12 }
  0x31   : > { %s851_s11 = sand.u32 (!%p211_p3), 1, %s693_s13  }
  0x32   : > { %214 = sbr.rel (%p211_p3) target bundleno = 297 (0x129), region = 32  ;;  %s496_s18 = sshll.u32 (!%p211_p3), %s851_s11, 5 }
  0x33   : > { %s217_s19 = scalar_lea.sflag (!%p211_p3), [#allocation3], %s851_s11  ;;  %s220_s21 = scalar_lea.vmem (!%p211_p3), [#allocation2], %s496_s18 }
  0x39   : > { %680 = dma.done.wait (%p786_p8), %s217_s19, 512  }
  0x3a   : > { %682 = vsyncadd (%p786_p8), %s217_s19, 4294966784  ;;  %p257_p9 = scmp.lt.s32.totalorder %s701_s15, 1  ;;  %v714_v0 = vmov 0.0|0.0   ;;  %vm715_vm0 = vmmov 0   ;;  %v716_v1 = vmov 0.0   ;;  %v717_v2 = vmov 0  }
  0x3b   : > { %522 = vmatprep.subr.bf16.mxu0 %v714_v0  ;;  %519 = vmatprep.mubr.msk.f32.mxu0 %vm715_vm0, %v716_v1  ;;  %v272_v3 = vld [vmem:[%s220_s21] sm:$0xff]  ;;  %v273_v4 = vld [vmem:[%s220_s21 + $0x8] sm:$0xff]  ;;  %v274_v5 = vld [vmem:[%s220_s21 + $0x10] sm:$0xff]  ;;  %vm282_vm1 = vcmask 261120   ;;  %s497_s29 = sshll.u32 %s851_s11, 3  ;;  %s502_s30 = sshll.u32 %s701_s15, 7 }
  0x3c   : > { %s258_s6 = scalar_select %p257_p9, %s701_s15, 1  ;;  %596 = vset.pattern.permute.xlu0 %v717_v2  ;;  %v523_v6 = vpack.c.bf16 %v273_v4, %v272_v3  ;;  %v275_v7 = vld [vmem:[%s220_s21 + $0x18] sm:$0xff] }
  0x3d   : > { %v526_v9 = vpack.c.bf16 %v275_v7, %v274_v5  ;;  %s256_s4 = scalar_lea.vmem [#allocation5], %s497_s29  ;;  %s872_s19 = scalar_lea.hbm %s924_s3, %s502_s30 }
  0x3e   : > { %s498_s8 = sshll.u32 %s258_s6, 3  ;;  %524 = vmatpush3.bf16.msra.mxu0 %v523_v6  ;;  %s373_s5 = sshll.u32 %s256_s4, 4  ;;  %s874_s5 = int_to_ptr.vmem [resolvable:$true] %s373_s5 }
  0x3f   : > { %s270_s22 = scalar_lea.vmem %s923_s2, %s498_s8  ;;  %525 = vmatprep.subr.bf16.mxu0 %v714_v0  ;;  %s263_s28 = scalar_lea.vmem %s921_s0, %s498_s8 }
  0x40   : > { %v276_v8 = vld [vmem:[%s270_s22] sm:$0xff]  ;;  %s358_s21 = scalar_lea.sflag [#allocation4], %s851_s11  ;;  %s627_s6 = scalar_lea.vmem %s874_s5, 128 }
  0x41   : > { %279 = vperm.xlu0 %596, %v276_v8   ;;  %v271_v10 = vld [vmem:[%s263_s28] sm:$0xff]  ;;  %p628_p8 = scmp.ne.s32.totalorder %s874_s5, %s627_s6  ;;  %p932_p11 = scmp.ne.s32.totalorder %s928_s25, 0 }
  0x42   : > { %527 = vmatpush3.bf16.msra.mxu0 %v526_v9  ;;  %s718_s15 = smov [#allocation5]  }
  0x43   : > { %p629_p0 = pnand %p628_p8, %p932_p11  ;;  %s631_s8 = sshll.u32 %s718_s15, 4  ;;  %s632_s8 = int_to_ptr.vmem [resolvable:$false] %s631_s8 }
  0x44   : > { %s633_s9 = scalar_lea.vmem %s632_s8, 256  ;;  %p634_p13 = scmp.lt.s32.totalorder %s874_s5, %s632_s8 }
  0x45   : > { %520 = vmatmul.mubr.msk.f32.vlgmr.msra.gmra.mrb[0].mxu0 %vm282_vm1, %v271_v10  ;;  %p630_p6 = pneg %p629_p0  ;;  %p635_p2 = scmp.lt.s32.totalorder %s633_s9, %s627_s6 }
  0x47   : > { %p636_p5 = por %p635_p2, %p634_p13 }
  0x49   : > { %p637_p4 = pnand %p636_p5, %p630_p6 }
  0xc0   : > { %v280_v11 = vpop.permute.xlu0 %279 }
 0x118   : > { %v352_v12 = vpop.f32.mrb[0].mxu0 }
 0x119   : > { %v353_v13 = vadd.f32 %v352_v12, %v280_v11  ;;  %v521_v14 = vpop.f32.mrb[1].mxu0 }
 0x11b   : > { %356 = vst [vmem:[%s256_s4] sm:$0xff] %v353_v13 }
 0x11c   : > { %640 = shalt.err (!%p637_p4)
}
 0x11d   : > { %s641_s11 = scalar_lea.hbm %s872_s19, 128  ;;  %s645_s24 = scalar_lea.hbm %s924_s3, 256 }
 0x11e   : > { %p642_p7 = scmp.ne.s32.totalorder %s872_s19, %s641_s11  ;;  %p646_p1 = scmp.lt.u32.totalorder %s872_s19, %s924_s3 }
 0x11f   : > { %p647_p3 = scmp.lt.u32.totalorder %s645_s24, %s641_s11  ;;  %p649_p8 = scmp.lt.u32.totalorder %s641_s11, %s872_s19 }
 0x120   : > { %p643_p10 = pnand %p642_p7, %p932_p11 }
 0x121   : > { %p648_p9 = por %p647_p3, %p646_p1 }
 0x122   : > { %p644_p12 = pneg %p643_p10 }
 0x123   : > { %p650_p0 = por %p649_p8, %p648_p9 }
 0x125   : > { %p651_p6 = pnand %p650_p0, %p644_p12 }
 0x127   : > { %654 = shalt.err (!%p651_p6)
}
 0x128   : > { %530 = dma.vmem_to_hbm [thread:$0]  (%p932_p11), %s874_s5, 128, %s872_s19, %s358_s21  }
 0x129 PF: > { %s385_s29 = sand.u32 1, %s689_s12   ;;  %p933_p13 = scmp.ne.s32.totalorder %s929_s27, 0 }
 0x12a   : > { %p934_p2 = scmp.ge.s32.totalorder %s709_s17, 2  ;;  %s386_s30 = scalar_lea.sflag [#allocation4], %s385_s29 }
 0x12c   : > { %p537_p5 = pnand %p934_p2, %p933_p13 }
 0x12e   : > { %684 = dma.done.wait (!%p537_p5), %s386_s30, 128  }
 0x12f   : > { %686 = vsyncadd (!%p537_p5), %s386_s30, 4294967168  ;;  %s19_s17 = sadd.s32 1, %s709_s17   ;;  %s935_s12 = smov %s693_s13 }
 0x130   : > { %p16_p4 = scmp.ge.s32.totalorder %s19_s17, 4   ;;  %s936_s13 = smov %s697_s14 }
 0x131   : > { %s937_s14 = smov %s795_s26  ;;  %s938_s15 = smov %s705_s16 }
 0x132   : > { %s939_s16 = smov %s941_s20  ;;  %18 = sbr.rel (!%p16_p4) target bundleno = 6 (0x6), region = 83 }
 0x139   :  { %391 = vsyncpa [#allocation3], 1 }
 0x13a   :  { %393 = vsyncpa [#allocation3 + $0x1], 1 }
 0x13b   :  { %394 = vsyncpa [#allocation4], 1 }
 0x13c   :  { %396 = vsyncpa [#allocation4 + $0x1], 1 }

</bundles_post_ra>
